<compile_context>
chip_gen: v7x
topology: tpu7x:2x2x1
jax: 0.10.0
libtpu: 0.0.40
codegen_flags: <defaults>
</compile_context>

<pallas_src>
import jax
import jax.numpy as jnp
from jax import lax
from jax.experimental import pallas as pl
from jax.experimental.pallas import tpu as pltpu


def _round_up(x, m):
    return ((x + m - 1) // m) * m


def _round_down(x, m):
    return (x // m) * m


def _tensorcores_per_chip():
    # Best-effort detection; only used to decide whether to split the class
    # axis for megacore.  Falls back to 1 (no split) on any surprise.
    try:
        kind = jax.devices()[0].device_kind.lower()
        if "v7" in kind:
            return 2
    except Exception:
        pass
    return 1


def _make_linear_softpool_kernel(T, TT, mask_t_tail):
    """Kernel factory: T / TT are static Python ints, mask_t_tail a static bool."""

    def kernel(td_ref, out_ref, num_acc, den_acc):
        # td_ref : (B, TT, TC) tile of the (B, T, C) input (no host-side pad).
        # out_ref: (B, TC)     tile of the (B, C) output (same tile across the
        #                      T axis -> resident accumulator).
        t = pl.program_id(1)  # T-reduction axis: last grid dim, "arbitrary"

        @pl.when(t == 0)
        def _init():
            num_acc[...] = jnp.zeros_like(num_acc)
            den_acc[...] = jnp.zeros_like(den_acc)

        # Upcast per-vreg BEFORE squaring so low-precision inputs match the
        # f32 reference; accumulation stays in f32 scratch.
        x = td_ref[...].astype(jnp.float32)

        if mask_t_tail:
            # Last T chunk is partial: out-of-bounds rows are unspecified and
            # MUST be zeroed before they enter either sum.
            limit = T - t * TT  # >= TT for all but the last chunk
            idx = lax.broadcasted_iota(jnp.int32, x.shape, 1)
            x = jnp.where(idx < limit, x, 0.0)

        num_acc[...] += jnp.sum(x * x, axis=1)
        den_acc[...] += jnp.sum(x, axis=1)

        @pl.when(t == pl.num_programs(1) - 1)
        def _finalize():
            # Division via EUP reciprocal (exact path) + VALU multiply.
            inv_den = pl.reciprocal(den_acc[...], approx=False)
            out_ref[...] = (num_acc[...] * inv_den).astype(out_ref.dtype)

    return kernel


def linear_soft_pool(logits, time_decision, *,
                     block_bytes_budget=8 << 20,
                     vmem_limit_bytes=48 << 20,
                     megacore_split=None):
    """Pallas LinearSoftPool (pooldim=1): sum(x^2, 1) / sum(x, 1).

    `logits` is unused (matches the PyTorch forward), kept for signature parity.
    """
    del logits  # unused by the reference forward
    B, T, C = time_decision.shape
    dtype = time_decision.dtype
    itemsize = jnp.dtype(dtype).itemsize

    if megacore_split is None:
        megacore_split = _tensorcores_per_chip() >= 2

    # ---- class (lane) tiling -------------------------------------------
    # Prefer a full-C block: each (b, t0:t0+TT) slab is then one contiguous
    # HBM segment and the T axis is swept exactly once.  Only tile C when a
    # minimal (B, 8, C) block would not fit the budget.
    min_full_c_block = B * 8 * C * itemsize
    if min_full_c_block <= block_bytes_budget:
        TC = C
    else:
        TC = max(128, _round_down(block_bytes_budget // (B * 8 * itemsize), 128))
        TC = min(TC, _round_up(C, 128))

    # v7x megacore: guarantee >= 2 blocks on the "parallel" class axis so both
    # TensorCores are used.  Partial last class blocks are fine: columns are
    # independent, OOB garbage never mixes into valid columns and OOB output
    # lanes are dropped on writeback.
    if megacore_split and pl.cdiv(C, TC) < 2 and C >= 256:
        TC = _round_up(pl.cdiv(C, 2), 128)

    c_blocks = pl.cdiv(C, TC)

    # ---- time (reduction) tiling ----------------------------------------
    # TT is either the full T (single chunk; full-dim block is always legal)
    # or a multiple of 8 sized so one input block fits the budget (the
    # pipeline double-buffers it).  A ragged tail is masked in-kernel.
    row_bytes = B * TC * itemsize
    max_tt = max(8, _round_down(block_bytes_budget // max(row_bytes, 1), 8))
    TT = T if T <= max_tt else max_tt
    t_blocks = pl.cdiv(T, TT)
    mask_t_tail = (T % TT) != 0

    kernel = _make_linear_softpool_kernel(T, TT, mask_t_tail)

    out = pl.pallas_call(
        kernel,
        out_shape=jax.ShapeDtypeStruct((B, C), dtype),
        grid_spec=pltpu.PrefetchScalarGridSpec(
            num_scalar_prefetch=0,
            grid=(c_blocks, t_blocks),
            in_specs=[pl.BlockSpec((B, TT, TC), lambda c, t: (0, t, c))],
            out_specs=pl.BlockSpec((B, TC), lambda c, t: (0, c)),
            scratch_shapes=[pltpu.VMEM((B, TC), jnp.float32),
                            pltpu.VMEM((B, TC), jnp.float32)],
        ),
        compiler_params=pltpu.CompilerParams(
            dimension_semantics=("parallel", "arbitrary"),
            vmem_limit_bytes=vmem_limit_bytes,
        ),
        cost_estimate=pl.CostEstimate(
            flops=3 * B * T * C,
            transcendentals=0,
            bytes_accessed=B * T * C * itemsize + B * C * itemsize,
        ),
    )(time_decision)
    return out


def _reference(time_decision):
    td = time_decision.astype(jnp.float32)
    return (jnp.sum(td * td, axis=1) / jnp.sum(td, axis=1)).astype(time_decision.dtype)


if __name__ == "__main__":
    key = jax.random.PRNGKey(0)
    k1, k2, k3, k4 = jax.random.split(key, 4)

    # Case 1: small shapes consistent with CRNN's temp_pool call
    # (decision_time = sigmoid(...).clamp(1e-7, 1) -> strictly positive).
    # Single (full-dim) block, no padding, no masking.
    B, T, C = 2, 16, 8
    time_decision = jnp.clip(
        jax.nn.sigmoid(jax.random.normal(k1, (B, T, C), dtype=jnp.float32)),
        1e-7, 1.0)
    logits = jax.random.normal(k2, (B, T, C), dtype=jnp.float32)  # unused, parity

    out = jax.block_until_ready(linear_soft_pool(logits, time_decision))
    ref = _reference(time_decision)
    assert out.shape == (B, C)
    assert jnp.allclose(out, ref, atol=1e-5, rtol=1e-5), "mismatch vs reference (small)"

    # Case 2: ragged T tail + tiled classes.  The tiny block budget forces
    # TT < T (with T % TT != 0 -> in-kernel mask) and TC < C (partial last
    # class block), exercising every multi-block code path.
    B2, T2, C2 = 3, 100, 200
    td2 = jnp.clip(
        jax.nn.sigmoid(jax.random.normal(k3, (B2, T2, C2), dtype=jnp.float32)),
        1e-7, 1.0)
    out2 = jax.block_until_ready(
        linear_soft_pool(None, td2, block_bytes_budget=8 * 1024))
    ref2 = _reference(td2)
    assert out2.shape == (B2, C2)
    assert jnp.allclose(out2, ref2, atol=1e-5, rtol=1e-5), "mismatch vs reference (ragged)"

    # Case 3: forced megacore class split (v7x path) -- correctness holds on
    # any generation; on v7x it gives both TensorCores a class tile.
    B3, T3, C3 = 2, 64, 512
    td3 = jnp.clip(
        jax.nn.sigmoid(jax.random.normal(k4, (B3, T3, C3), dtype=jnp.float32)),
        1e-7, 1.0)
    out3 = jax.block_until_ready(linear_soft_pool(None, td3, megacore_split=True))
    ref3 = _reference(td3)
    assert out3.shape == (B3, C3)
    assert jnp.allclose(out3, ref3, atol=1e-5, rtol=1e-5), "mismatch vs reference (split)"

    print("KERNEL_OK")
</pallas_src>

<mosaic_0001>
module attributes {stable_mosaic.version = 11 : i64} {
  func.func @kernel(%arg0: i32, %arg1: i32, %arg2: memref<2x16x8xf32, #tpu.memory_space<vmem>>, %arg3: memref<2x8xf32, #tpu.memory_space<vmem>>, %arg4: memref<2x8xf32, #tpu.memory_space<vmem>>, %arg5: memref<2x8xf32, #tpu.memory_space<vmem>>) attributes {dimension_semantics = [#tpu.dimension_semantics<parallel>, #tpu.dimension_semantics<arbitrary>], iteration_bounds = array<i64: 1, 1>, scalar_prefetch = 0 : i64, scratch_operands = 2 : i64, tpu.core_type = #tpu.core_type<tc>, window_params = [{transform_indices = @transform_0, window_bounds = array<i64: 2, 16, 8>}, {transform_indices = @transform_1, window_bounds = array<i64: 2, 8>}]} {
    %c0_i32 = arith.constant 0 : i32
    %0 = arith.cmpi eq, %arg1, %c0_i32 : i32
    %1 = arith.extui %0 : i1 to i32
    %c0_i32_0 = arith.constant 0 : i32
    %2 = arith.cmpi ne, %1, %c0_i32_0 : i32
    scf.if %2 {
      %cst_14 = arith.constant 0.000000e+00 : f32
      %16 = vector.broadcast %cst_14 : f32 to vector<2x8xf32>
      %c0_15 = arith.constant 0 : index
      %c0_16 = arith.constant 0 : index
      %17 = vector.load %arg4[%c0_15, %c0_16] : memref<2x8xf32, #tpu.memory_space<vmem>>, vector<2x8xf32>
      tpu.vector_store %arg4[%c0_15, %c0_16], %16 {strides = array<i32>} : memref<2x8xf32, #tpu.memory_space<vmem>>, vector<2x8xf32>,
      %cst_17 = arith.constant 0.000000e+00 : f32
      %18 = vector.broadcast %cst_17 : f32 to vector<2x8xf32>
      %c0_18 = arith.constant 0 : index
      %c0_19 = arith.constant 0 : index
      %19 = vector.load %arg5[%c0_18, %c0_19] : memref<2x8xf32, #tpu.memory_space<vmem>>, vector<2x8xf32>
      tpu.vector_store %arg5[%c0_18, %c0_19], %18 {strides = array<i32>} : memref<2x8xf32, #tpu.memory_space<vmem>>, vector<2x8xf32>,
    } else {
    }
    %c0 = arith.constant 0 : index
    %c0_1 = arith.constant 0 : index
    %c0_2 = arith.constant 0 : index
    %3 = vector.load %arg2[%c0, %c0_1, %c0_2] : memref<2x16x8xf32, #tpu.memory_space<vmem>>, vector<2x16x8xf32>
    %c0_3 = arith.constant 0 : index
    %c0_4 = arith.constant 0 : index
    %4 = vector.load %arg4[%c0_3, %c0_4] : memref<2x8xf32, #tpu.memory_space<vmem>>, vector<2x8xf32>
    %5 = arith.mulf %3, %3 : vector<2x16x8xf32>
    %cst = arith.constant dense<0.000000e+00> : vector<2x8xf32>
    %6 = vector.multi_reduction <add>, %5, %cst [1] : vector<2x16x8xf32> to vector<2x8xf32>
    %7 = arith.addf %4, %6 : vector<2x8xf32>
    %c0_5 = arith.constant 0 : index
    %c0_6 = arith.constant 0 : index
    %8 = vector.load %arg4[%c0_5, %c0_6] : memref<2x8xf32, #tpu.memory_space<vmem>>, vector<2x8xf32>
    tpu.vector_store %arg4[%c0_5, %c0_6], %7 {strides = array<i32>} : memref<2x8xf32, #tpu.memory_space<vmem>>, vector<2x8xf32>,
    %c0_7 = arith.constant 0 : index
    %c0_8 = arith.constant 0 : index
    %9 = vector.load %arg5[%c0_7, %c0_8] : memref<2x8xf32, #tpu.memory_space<vmem>>, vector<2x8xf32>
    %cst_9 = arith.constant dense<0.000000e+00> : vector<2x8xf32>
    %10 = vector.multi_reduction <add>, %3, %cst_9 [1] : vector<2x16x8xf32> to vector<2x8xf32>
    %11 = arith.addf %9, %10 : vector<2x8xf32>
    %c0_10 = arith.constant 0 : index
    %c0_11 = arith.constant 0 : index
    %12 = vector.load %arg5[%c0_10, %c0_11] : memref<2x8xf32, #tpu.memory_space<vmem>>, vector<2x8xf32>
    tpu.vector_store %arg5[%c0_10, %c0_11], %11 {strides = array<i32>} : memref<2x8xf32, #tpu.memory_space<vmem>>, vector<2x8xf32>,
    %c0_i32_12 = arith.constant 0 : i32
    %13 = arith.cmpi eq, %arg1, %c0_i32_12 : i32
    %14 = arith.extui %13 : i1 to i32
    %c0_i32_13 = arith.constant 0 : i32
    %15 = arith.cmpi ne, %14, %c0_i32_13 : i32
    scf.if %15 {
      %c0_14 = arith.constant 0 : index
      %c0_15 = arith.constant 0 : index
      %16 = vector.load %arg5[%c0_14, %c0_15] : memref<2x8xf32, #tpu.memory_space<vmem>>, vector<2x8xf32>
      %17 = tpu.reciprocal %16 : vector<2x8xf32> -> vector<2x8xf32>
      %c0_16 = arith.constant 0 : index
      %c0_17 = arith.constant 0 : index
      %18 = vector.load %arg4[%c0_16, %c0_17] : memref<2x8xf32, #tpu.memory_space<vmem>>, vector<2x8xf32>
      %19 = arith.mulf %18, %17 : vector<2x8xf32>
      %c0_18 = arith.constant 0 : index
      %c0_19 = arith.constant 0 : index
      %20 = vector.load %arg3[%c0_18, %c0_19] : memref<2x8xf32, #tpu.memory_space<vmem>>, vector<2x8xf32>
      tpu.vector_store %arg3[%c0_18, %c0_19], %19 {strides = array<i32>} : memref<2x8xf32, #tpu.memory_space<vmem>>, vector<2x8xf32>,
    } else {
    }
    return
  }
  func.func @transform_0(%arg0: i32, %arg1: i32) -> (i32, i32, i32) {
    %c0_i32 = arith.constant 0 : i32
    %c0_i32_0 = arith.constant 0 : i32
    return %c0_i32, %arg1, %arg0 : i32, i32, i32
  }
  func.func @transform_1(%arg0: i32, %arg1: i32) -> (i32, i32) {
    %c0_i32 = arith.constant 0 : i32
    %c0_i32_0 = arith.constant 0 : i32
    return %c0_i32, %arg0 : i32, i32
  }
}

</mosaic_0001>

<bundles_post_ra>
// kernel: tpu_custom_call.1
= control target key start
LH: loop header
LB: loop body
LE: loop exit
PB: predicated region body
PF: predicated region fallthrough
CT: control target
= control target key end

     0   :  { %vm13_vm0 = vcmask 58368   ;;  %vm25_vm1 = vcmask 64512   ;;  %v127_v3 = vmov 0.0   ;;  %s176_s0 = inlined_call_operand.vmem [shape: f32[2,16,8], index: 0, kind: input, shape index: {}]   ;;  %s177_s1 = inlined_call_operand.hbm [shape: f32[2,8], index: 1, kind: output, shape index: {}]  }
   0x1   :  { %v16_v0 = vld [vmem:[%s176_s0] sm:$0xff]  ;;  %v17_v1 = vld [vmem:[%s176_s0 + $0x8] sm:$0xff]  ;;  %v18_v2 = vld [vmem:[%s176_s0 + $0x10] sm:$0xff]  ;;  %15 = vst.msk [vmem:[#allocation3] sm:$0x3] %vm13_vm0, %v127_v3 }
   0x2   :  { %14 = vst.msk [vmem:[#allocation2] sm:$0x3] %vm13_vm0, %v127_v3  ;;  %v19_v4 = vld [vmem:[%s176_s0 + $0x18] sm:$0xff]  ;;  %v53_v5 = vsel %vm25_vm1, %v16_v0, 0.0  ;;  %v54_v6 = vsel %vm25_vm1, %v17_v1, 0.0  ;;  %v62_v7 = vsel %vm25_vm1, %v18_v2, 0.0  ;;  %v21_v10 = vmul.f32 %v16_v0, %v16_v0 }
   0x3   :  { %v55_v8 = vadd.f32 %v54_v6, %v53_v5  ;;  %v63_v9 = vsel %vm25_vm1, %v19_v4, 0.0  ;;  %v22_v11 = vmul.f32 %v17_v1, %v17_v1 }
   0x4   :  { %6 = vsyncpa [#allocation5], 0  ;;  %v64_v12 = vadd.f32 %v63_v9, %v62_v7  ;;  %v23_v13 = vmul.f32 %v18_v2, %v18_v2  ;;  %v24_v14 = vmul.f32 %v19_v4, %v19_v4  ;;  %v26_v16 = vsel %vm25_vm1, %v21_v10, 0.0  ;;  %s128_s0 = smov [#allocation4]  }
   0x5   :  { %v56_v15 = vrot.slane %v55_v8, 4  ;;  %v27_v17 = vsel %vm25_vm1, %v22_v11, 0.0  ;;  %vm46_vm2 = vcmask 1041409   ;;  %s91_s14 = sshll.u32 %s128_s0, 4  ;;  %s92_s14 = int_to_ptr.vmem [resolvable:$true] %s91_s14 }
   0x6   :  { %v65_v18 = vrot.slane %v64_v12, 4  ;;  %v28_v19 = vadd.f32 %v27_v17, %v26_v16  ;;  %v35_v20 = vsel %vm25_vm1, %v23_v13, 0.0  ;;  %v36_v21 = vsel %vm25_vm1, %v24_v14, 0.0  ;;  %s103_s15 = scalar_lea.vmem %s92_s14, 32  ;;  %p108_p1 = scmp.lt.s32.totalorder %s92_s14, %s92_s14 }
   0x7   :  { %v57_v22 = vadd.f32 %v56_v15, %v55_v8  ;;  %v37_v23 = vadd.f32 %v36_v21, %v35_v20  ;;  %p104_p0 = scmp.ne.s32.totalorder %s92_s14, %s103_s15  ;;  %p109_p2 = scmp.lt.s32.totalorder %s103_s15, %s103_s15 }
   0x8   :  { %v66_v24 = vadd.f32 %v65_v18, %v64_v12  ;;  %v29_v25 = vrot.slane %v28_v19, 4  ;;  %v52_v40 = vld [vmem:[#allocation3] sm:$0x3] }
   0x9   :  { %v58_v26 = vrot.slane %v57_v22, 2  ;;  %v38_v27 = vrot.slane %v37_v23, 4  ;;  %v20_v47 = vld [vmem:[#allocation2] sm:$0x3]  ;;  %p110_p3 = por %p109_p2, %p108_p1 }
   0xa   :  { %v67_v28 = vrot.slane %v66_v24, 2  ;;  %v30_v29 = vadd.f32 %v29_v25, %v28_v19 }
   0xb   :  { %v59_v30 = vadd.f32 %v58_v26, %v57_v22  ;;  %v39_v31 = vadd.f32 %v38_v27, %v37_v23  ;;  %p111_p4 = pnand %p110_p3, %p104_p0 }
   0xc   :  { %v68_v32 = vadd.f32 %v67_v28, %v66_v24  ;;  %v31_v33 = vrot.slane %v30_v29, 2 }
   0xd   :  { %v60_v34 = vrot.slane %v59_v30, 1  ;;  %v40_v35 = vrot.slane %v39_v31, 2 }
   0xe   :  { %v69_v36 = vrot.slane %v68_v32, 1  ;;  %v32_v37 = vadd.f32 %v31_v33, %v30_v29 }
   0xf   :  { %v61_v38 = vadd.f32 %v60_v34, %v59_v30  ;;  %v41_v39 = vadd.f32 %v40_v35, %v39_v31 }
  0x10   :  { %v70_v41 = vadd.f32 %v69_v36, %v68_v32  ;;  %v33_v42 = vrot.slane %v32_v37, 1 }
  0x11   :  { %v42_v43 = vrot.slane %v41_v39, 1 }
  0x12   :  { %v73_v44 = vsel %vm46_vm2, %v70_v41, %v61_v38  ;;  %v34_v45 = vadd.f32 %v33_v42, %v32_v37 }
  0x13   :  { %v75_v46 = vadd.f32 %v73_v44, %v52_v40  ;;  %v43_v48 = vadd.f32 %v42_v43, %v41_v39 }
  0x15   :  { %76 = vst.msk [vmem:[#allocation3] sm:$0x3] %vm13_vm0, %v75_v46  ;;  %v47_v49 = vsel %vm46_vm2, %v43_v48, %v34_v45 }
  0x16   :  { %v49_v50 = vadd.f32 %v47_v49, %v20_v47 }
  0x18   :  { %51 = vst.msk [vmem:[#allocation2] sm:$0x3] %vm13_vm0, %v49_v50 }
  0x1c   :  { %v80_v51 = vld [vmem:[#allocation3] sm:$0x3] }
  0x1d   :  { %101 = vrcp.f32 %v80_v51 }
  0x1f   :  { %v82_v52 = vld [vmem:[#allocation2] sm:$0x3] }
  0x27   :  { %v102_v53 = vpop.eup %101 }
  0x28   :  { %v83_v54 = vmul.f32 %v102_v53, %v82_v52 }
  0x2a   :  { %84 = vst.msk [vmem:[#allocation4] sm:$0x3] %vm13_vm0, %v83_v54 }
  0x2b   :  { %114 = shalt.err (!%p111_p4)
}
  0x2c   :  { %s115_s18 = scalar_lea.hbm %s177_s1, 32 }
  0x2d   :  { %p116_p5 = scmp.ne.s32.totalorder %s177_s1, %s115_s18  ;;  %p119_p6 = scmp.lt.u32.totalorder %s115_s18, %s177_s1 }
  0x2f   :  { %p121_p7 = pnand %p119_p6, %p116_p5 }
  0x31   :  { %124 = shalt.err (!%p121_p7)
}
  0x32   :  { %94 = dma.vmem_to_hbm [thread:$0]  %s92_s14, 32, %s177_s1, [#allocation5]  }
  0x33   :  { %125 = dma.done.wait [#allocation5], 32  }
  0x34   :  { %126 = vsyncadd [#allocation5], 4294967264 }
  0x35   :  { %98 = vsyncpa [#allocation5], 1 }

</bundles_post_ra>
